<compile_context>
chip_gen: v7x
topology: tpu7x:2x2x1
jax: 0.10.0
libtpu: 0.0.40
codegen_flags: <defaults>
</compile_context>

<pallas_src>
import functools
import math

import jax
import jax.numpy as jnp
from jax.experimental import pallas as pl
from jax.experimental.pallas import tpu as pltpu


# ----------------------------------------------------------------------------- kernel
def _exp_feature_kernel(x_ref, wt_ref, b_ref, o_ref, *, precision):
    # MXU matmul with f32 accumulation, f32 bias add + cos, cast only at store.
    proj = jnp.dot(
        x_ref[...], wt_ref[...],
        preferred_element_type=jnp.float32,
        precision=precision,
    )
    o_ref[...] = jnp.cos(proj + b_ref[...]).astype(o_ref.dtype)


# ----------------------------------------------------------------------------- helpers
def _fold_factor(D, F, M=None):
    """Fold factor so BOTH k*D and k*F are multiples of 128 lanes (power of 2)."""
    k = math.lcm(128 // math.gcd(D, 128), 128 // math.gcd(F, 128))
    if M is not None:
        # Keep the fold exact with no padding: k is a power of two, so this is
        # the largest power-of-two fold that divides the token count.
        k = math.gcd(k, M)
    return max(k, 1)


def _fold_params(w, b, k, param_dtype):
    """Block-diagonal folded weight (k*D, k*F) and tiled f32 bias (1, k*F)."""
    w2 = jnp.asarray(w)
    w2 = w2.reshape(w2.shape[-2], w2.shape[-1])            # (F, D), drop broadcast dims
    F, _ = w2.shape
    wt = jnp.transpose(w2).astype(param_dtype)             # (D, F)
    wtf = jnp.kron(jnp.eye(k, dtype=param_dtype), wt)      # (k*D, k*F) block-diagonal
    bf = jnp.tile(jnp.asarray(b, jnp.float32).reshape(1, F), (1, k))   # (1, k*F)
    return wtf, bf


def _feature_map_folded(x, wtf, bf, k, *, tile_m, out_dtype, vmem_budget_bytes):
    B, H, L, D = x.shape
    Df, Ff = wtf.shape
    F = Ff // k
    M = B * H * L
    assert M % k == 0 and Df == k * D
    R = M // k                                             # folded rows

    xf = x.reshape(R, Df)                                  # pure row-major reshape, no copy

    in_sz = jnp.dtype(x.dtype).itemsize
    w_sz = jnp.dtype(wtf.dtype).itemsize
    out_sz = jnp.dtype(out_dtype).itemsize

    # ---- row-tile selection under a VMEM budget (double-buffered x/out tiles
    # + f32 proj intermediate + resident weight/bias) -----------------------------
    desired_rows = max(1, tile_m // k)
    resident = 2 * Df * Ff * w_sz + 2 * Ff * 4
    per_row = 2 * Df * in_sz + 2 * Ff * out_sz + Ff * 4
    budget_rows = max(8, (vmem_budget_bytes - resident) // per_row)
    tile_rows = min(desired_rows, budget_rows)
    if tile_rows >= R:
        tile_rows = R                                      # full-extent block: always legal
    else:
        tile_rows = max(8, (tile_rows // 8) * 8)           # sublane-aligned
    grid = pl.cdiv(R, tile_rows)                           # trailing partial block is masked

    cost = pl.CostEstimate(
        flops=2 * R * Df * Ff,
        transcendentals=M * F,
        bytes_accessed=in_sz * M * D + w_sz * Df * Ff + out_sz * M * F,
    )

    # f32 bit-parity with the PyTorch reference is free (MXU has huge slack here).
    precision = (jax.lax.Precision.HIGHEST
                 if (x.dtype == jnp.float32 and wtf.dtype == jnp.float32) else None)
    kernel = functools.partial(_exp_feature_kernel, precision=precision)

    out = pl.pallas_call(
        kernel,
        out_shape=jax.ShapeDtypeStruct((R, Ff), out_dtype),
        grid_spec=pltpu.PrefetchScalarGridSpec(
            num_scalar_prefetch=0,
            grid=(grid,),
            in_specs=[
                pl.BlockSpec((tile_rows, Df), lambda i: (i, 0)),   # folded X tile (lane-dense)
                pl.BlockSpec((Df, Ff), lambda i: (0, 0)),          # block-diag Wt (resident)
                pl.BlockSpec((1, Ff), lambda i: (0, 0)),           # tiled bias (resident)
            ],
            out_specs=pl.BlockSpec((tile_rows, Ff), lambda i: (i, 0)),  # lane-dense output
        ),
        compiler_params=pltpu.CompilerParams(
            dimension_semantics=("parallel",),             # megacore-shardable (v7x)
        ),
        cost_estimate=cost,
    )(xf, wtf, bf)

    # Unfold: (R, k*F) is the row-major reshape of (M, F) -> (B, H, L, F).
    return out.reshape(B, H, L, F)


# ----------------------------------------------------------------------------- public API
def exp_kernel_feature_map(x, w, b, *, tile_m=16384, out_dtype=None,
                           param_dtype=None, vmem_budget_bytes=24 << 20):
    """One-shot convenience wrapper.

    x: (B, H, L, D); w: (F, D) (or (1,1,1,F,D)); b: (F,) (or (1,1,1,F)).
    Returns cos(x @ w^T + b): (B, H, L, F).
    For the bandwidth-bound fast path pass bf16 x and out_dtype=jnp.bfloat16.
    """
    B, H, L, D = x.shape
    w2 = jnp.asarray(w)
    w2 = w2.reshape(-1, w2.shape[-1])
    F = w2.shape[0]
    M = B * H * L
    k = _fold_factor(D, F, M)
    pdt = x.dtype if param_dtype is None else param_dtype
    wtf, bf = _fold_params(w2, b, k, pdt)
    return _feature_map_folded(
        x, wtf, bf, k,
        tile_m=tile_m,
        out_dtype=x.dtype if out_dtype is None else out_dtype,
        vmem_budget_bytes=vmem_budget_bytes,
    )


def make_exp_kernel_feature_map(w, b, *, tile_m=16384, out_dtype=None,
                                param_dtype=jnp.float32, vmem_budget_bytes=24 << 20):
    """Hoist the parameter fold (transpose + kron + tile) out of the hot path.

    Returns a jitted fn(x) reusing the pre-folded weight/bias every forward.
    """
    w2 = jnp.asarray(w)
    w2 = w2.reshape(-1, w2.shape[-1])
    F, D = w2.shape
    k = _fold_factor(D, F)                                 # M-agnostic ideal fold
    wtf, bf = _fold_params(w2, b, k, param_dtype)          # computed ONCE, eagerly
    wtf = jax.device_put(wtf)
    bf = jax.device_put(bf)

    @jax.jit
    def fwd(x):
        M = x.shape[0] * x.shape[1] * x.shape[2]
        odt = x.dtype if out_dtype is None else out_dtype
        if M % k == 0:
            return _feature_map_folded(x, wtf, bf, k, tile_m=tile_m, out_dtype=odt,
                                       vmem_budget_bytes=vmem_budget_bytes)
        # Rare fallback (token count incompatible with the ideal fold): refold
        # with the largest k | M; still no padding, just a lane-sparser layout.
        return exp_kernel_feature_map(x, w2, b, tile_m=tile_m, out_dtype=odt,
                                      param_dtype=param_dtype,
                                      vmem_budget_bytes=vmem_budget_bytes)

    return fwd


def exp_kernel_feature_map_ref(x, w, b):
    """Pure-JAX reference mirroring the PyTorch forward exactly."""
    w2 = jnp.asarray(w)
    w2 = w2.reshape(-1, w2.shape[-1])
    proj = jnp.einsum("bhld,fd->bhlf", x, w2) + jnp.asarray(b).reshape(-1)
    return jnp.cos(proj)


# ----------------------------------------------------------------------------- demo / test
if __name__ == "__main__":
    # Shapes consistent with the module: batch=2, heads=4, seq=16, head_dim=16,
    # num_features=32.
    B, H, L = 2, 4, 16
    head_dim, num_features = 16, 32

    key = jax.random.PRNGKey(0)
    kx, kw, kb = jax.random.split(key, 3)

    x = jax.random.normal(kx, (B, H, L, head_dim), dtype=jnp.float32)
    # nn.Parameter shapes (broadcast dims dropped): w ~ randn(F, D), b = 2*pi*U[0,1)(F)
    w = jax.random.normal(kw, (num_features, head_dim), dtype=jnp.float32)
    b = 2.0 * math.pi * jax.random.uniform(kb, (num_features,), dtype=jnp.float32)

    # Fast path: parameters folded once, reused across forwards.
    fwd = make_exp_kernel_feature_map(w, b)
    out = jax.block_until_ready(fwd(x))

    ref = exp_kernel_feature_map_ref(x, w, b)
    assert out.shape == (B, H, L, num_features)
    assert jnp.allclose(out, ref, atol=1e-4, rtol=1e-5), "mismatch vs reference (folded path)"

    # Also exercise the multi-block grid with a masked trailing partial block
    # (R=20 rows, tile_rows=8 -> grid=3) and the one-shot wrapper.
    x2 = jax.random.normal(kx, (B, H, 20, head_dim), dtype=jnp.float32)
    out2 = jax.block_until_ready(exp_kernel_feature_map(x2, w, b, tile_m=64))
    ref2 = exp_kernel_feature_map_ref(x2, w, b)
    assert out2.shape == (B, H, 20, num_features)
    assert jnp.allclose(out2, ref2, atol=1e-4, rtol=1e-5), "mismatch vs reference (partial block)"

    print("KERNEL_OK")
</pallas_src>

<mosaic_0001>
module attributes {stable_mosaic.version = 11 : i64} {
  func.func @_exp_feature_kernel(%arg0: i32, %arg1: memref<16x128xf32, #tpu.memory_space<vmem>>, %arg2: memref<128x256xf32, #tpu.memory_space<vmem>>, %arg3: memref<1x256xf32, #tpu.memory_space<vmem>>, %arg4: memref<16x256xf32, #tpu.memory_space<vmem>>) attributes {dimension_semantics = [#tpu.dimension_semantics<parallel>], iteration_bounds = array<i64: 1>, scalar_prefetch = 0 : i64, scratch_operands = 0 : i64, tpu.core_type = #tpu.core_type<tc>, window_params = [{transform_indices = @transform_0, window_bounds = array<i64: 16, 128>}, {pipeline_mode = #tpu.pipeline_mode<synchronous>, transform_indices = @transform_1, window_bounds = array<i64: 128, 256>}, {pipeline_mode = #tpu.pipeline_mode<synchronous>, transform_indices = @transform_2, window_bounds = array<i64: 1, 256>}, {transform_indices = @transform_3, window_bounds = array<i64: 16, 256>}]} {
    %c0 = arith.constant 0 : index
    %c0_0 = arith.constant 0 : index
    %0 = vector.load %arg1[%c0, %c0_0] : memref<16x128xf32, #tpu.memory_space<vmem>>, vector<16x128xf32>
    %c0_1 = arith.constant 0 : index
    %c0_2 = arith.constant 0 : index
    %1 = vector.load %arg2[%c0_1, %c0_2] : memref<128x256xf32, #tpu.memory_space<vmem>>, vector<128x256xf32>
    %cst = arith.constant dense<0.000000e+00> : vector<16x256xf32>
    %2 = tpu.matmul %0, %1, %cst {dimension_numbers = #tpu.dot_dimension_numbers<[1], [0], [0], [1], [0, 0, 1, 1], [], []>, precision = #tpu.contract_precision<fp32>} : vector<16x128xf32>, vector<128x256xf32>, vector<16x256xf32> -> vector<16x256xf32>
    %c0_3 = arith.constant 0 : index
    %c0_4 = arith.constant 0 : index
    %3 = vector.load %arg3[%c0_3, %c0_4] : memref<1x256xf32, #tpu.memory_space<vmem>>, vector<1x256xf32>
    %4 = vector.broadcast %3 : vector<1x256xf32> to vector<16x256xf32>
    %5 = arith.addf %2, %4 : vector<16x256xf32>
    %6 = math.cos %5 : vector<16x256xf32>
    %c0_5 = arith.constant 0 : index
    %c0_6 = arith.constant 0 : index
    %7 = vector.load %arg4[%c0_5, %c0_6] : memref<16x256xf32, #tpu.memory_space<vmem>>, vector<16x256xf32>
    tpu.vector_store %arg4[%c0_5, %c0_6], %6 {strides = array<i32>} : memref<16x256xf32, #tpu.memory_space<vmem>>, vector<16x256xf32>,
    return
  }
  func.func @transform_0(%arg0: i32) -> (i32, i32) {
    %c0_i32 = arith.constant 0 : i32
    %c0_i32_0 = arith.constant 0 : i32
    return %arg0, %c0_i32 : i32, i32
  }
  func.func @transform_1(%arg0: i32) -> (i32, i32) {
    %c0_i32 = arith.constant 0 : i32
    %c0_i32_0 = arith.constant 0 : i32
    %c0_i32_1 = arith.constant 0 : i32
    return %c0_i32, %c0_i32_0 : i32, i32
  }
  func.func @transform_2(%arg0: i32) -> (i32, i32) {
    %c0_i32 = arith.constant 0 : i32
    %c0_i32_0 = arith.constant 0 : i32
    %c0_i32_1 = arith.constant 0 : i32
    return %c0_i32, %c0_i32_0 : i32, i32
  }
  func.func @transform_3(%arg0: i32) -> (i32, i32) {
    %c0_i32 = arith.constant 0 : i32
    %c0_i32_0 = arith.constant 0 : i32
    return %arg0, %c0_i32 : i32, i32
  }
}

</mosaic_0001>

<bundles_post_ra>
// kernel: fwd.1
= control target key start
LH: loop header
LB: loop body
LE: loop exit
PB: predicated region body
PF: predicated region fallthrough
CT: control target
= control target key end

     0   :  { %8 = vsyncpa [#allocation3], 0  ;;  %s1697_s12 = smov [#allocation2]   ;;  %s2311_s0 = inlined_call_operand.vmem [shape: f32[16,128], index: 0, kind: input, shape index: {}]   ;;  %s2312_s1 = inlined_call_operand.hbm [shape: f32[128,256], index: 1, kind: input, shape index: {}]   ;;  %s2313_s2 = inlined_call_operand.vmem [shape: f32[1,256], index: 2, kind: input, shape index: {}]   ;;  %s2314_s3 = inlined_call_operand.vmem [shape: f32[16,256], index: 3, kind: output, shape index: {}]  }
   0x1   :  { %s16_s13 = sshll.u32 %s1697_s12, 4  ;;  %s1673_s16 = scalar_lea.hbm %s2312_s1, 4096  ;;  %s17_s13 = int_to_ptr.vmem [resolvable:$true] %s16_s13 }
   0x2   :  { %p1674_p0 = scmp.ne.s32.totalorder %s2312_s1, %s1673_s16  ;;  %p1677_p1 = scmp.lt.u32.totalorder %s1673_s16, %s2312_s1 }
   0x4   :  { %p1679_p2 = pnand %p1677_p1, %p1674_p0 }
   0x6   :  { %1682 = shalt.err (!%p1679_p2)
}
   0x7   :  { %s1683_s21 = scalar_lea.vmem %s17_s13, 4096  ;;  %p1688_p4 = scmp.lt.s32.totalorder %s17_s13, %s17_s13 }
   0x8   :  { %p1684_p3 = scmp.ne.s32.totalorder %s17_s13, %s1683_s21  ;;  %p1689_p5 = scmp.lt.s32.totalorder %s1683_s21, %s1683_s21 }
   0xa   :  { %p1690_p6 = por %p1689_p5, %p1688_p4 }
   0xc   :  { %p1691_p7 = pnand %p1690_p6, %p1684_p3 }
   0xe   :  { %1694 = shalt.err (!%p1691_p7)
}
   0xf   :  { %s1698_s22 = smov 256   ;;  %s1699_s23 = smov 16  }
  0x10   :  { %22 = dma.hbm_to_vmem [thread:$0]  %s2312_s1, 4096, %s17_s13, [#allocation3], %s1698_s22, %s1698_s22, %s1699_s23  }
  0x11   :  { %1695 = dma.done.wait [#allocation3], 4096  }
  0x12   :  { %1696 = vsyncadd [#allocation3], 4294963200  ;;  %v2315_v0 = vmov 0.0   ;;  %v31_v1 = vld [vmem:[#allocation2 + $0x8] sm:$0xff]  ;;  %v33_v2 = vld [vmem:[#allocation2 + $0x18] sm:$0xff] }
  0x13   :  { %170 = vmatprep.mubr.f32.mxu1 %v2315_v0  ;;  %673 = vmatprep.mubr.f32.mxu0 %v2315_v0  ;;  %v30_v3 = vld [vmem:[#allocation2] sm:$0xff]  ;;  %v74_v4 = vand.u32 4294901760, %v31_v1  ;;  %v78_v5 = vand.u32 4294901760, %v33_v2  ;;  %v32_v6 = vld [vmem:[#allocation2 + $0x10] sm:$0xff]  ;;  %v35_v8 = vld [vmem:[#allocation2 + $0x28] sm:$0xff] }
  0x14   :  { %v76_v7 = vand.u32 4294901760, %v30_v3  ;;  %v37_v9 = vld [vmem:[#allocation2 + $0x38] sm:$0xff]  ;;  %v80_v10 = vand.u32 4294901760, %v32_v6  ;;  %v82_v11 = vand.u32 4294901760, %v35_v8  ;;  %v34_v13 = vld [vmem:[#allocation2 + $0x20] sm:$0xff]  ;;  %v36_v14 = vld [vmem:[#allocation2 + $0x30] sm:$0xff] }
  0x15   :  { %v86_v12 = vand.u32 4294901760, %v37_v9  ;;  %v39_v15 = vld [vmem:[#allocation2 + $0x48] sm:$0xff]  ;;  %v1741_v16 = vpack.c.bf16 %v78_v5, %v74_v4  ;;  %v41_v17 = vld [vmem:[#allocation2 + $0x58] sm:$0xff]  ;;  %v38_v18 = vld [vmem:[#allocation2 + $0x40] sm:$0xff]  ;;  %v1743_v20 = vsub.f32 %v31_v1, %v74_v4  ;;  %v1750_v25 = vsub.f32 %v33_v2, %v78_v5 }
  0x16   :  { %v40_v19 = vld [vmem:[#allocation2 + $0x50] sm:$0xff]  ;;  %v1745_v21 = vpack.c.bf16 %v80_v10, %v76_v7  ;;  %v43_v23 = vld [vmem:[#allocation2 + $0x68] sm:$0xff]  ;;  %v45_v24 = vld [vmem:[#allocation2 + $0x78] sm:$0xff]  ;;  %v84_v26 = vand.u32 4294901760, %v34_v13  ;;  %v88_v27 = vand.u32 4294901760, %v36_v14  ;;  %v90_v28 = vand.u32 4294901760, %v39_v15 }
  0x17   :  { %v1747_v22 = vpack.c.bf16 %v86_v12, %v82_v11  ;;  %1416 = vmatprep.subr.bf16.mxu1 %v1741_v16  ;;  %1512 = vmatprep.subr.bf16.mxu0 %v1741_v16  ;;  %v1754_v29 = vsub.f32 %v30_v3, %v76_v7  ;;  %v94_v30 = vand.u32 4294901760, %v41_v17  ;;  %v92_v31 = vand.u32 4294901760, %v38_v18  ;;  %v42_v37 = vld [vmem:[#allocation2 + $0x60] sm:$0xff]  ;;  %v44_v38 = vld [vmem:[#allocation2 + $0x70] sm:$0xff]  ;;  %v47_v39 = vld [vmem:[#allocation2 + $0x88] sm:$0xff] }
  0x18   :  { %2341 = vst [vmem:[#allocation5_spill] sm:$0xff] %v1745_v21  ;;  %1418 = vmatpush1.bf16.msra.mxu1 %v1745_v21  ;;  %1514 = vmatpush1.bf16.msra.mxu0 %v1745_v21  ;;  %v96_v32 = vand.u32 4294901760, %v40_v19  ;;  %v1757_v33 = vsub.f32 %v32_v6, %v80_v10  ;;  %v1761_v34 = vpack.c.bf16 %v88_v27, %v84_v26  ;;  %v98_v35 = vand.u32 4294901760, %v43_v23  ;;  %v49_v44 = vld [vmem:[#allocation2 + $0x98] sm:$0xff]  ;;  %v46_v45 = vld [vmem:[#allocation2 + $0x80] sm:$0xff]  ;;  %v48_v46 = vld [vmem:[#allocation2 + $0x90] sm:$0xff] }
  0x19   :  { %2342 = vst [vmem:[#allocation6_spill] sm:$0xff] %v1747_v22  ;;  %1420 = vmatprep.subr.bf16.mxu1 %v1747_v22  ;;  %1516 = vmatprep.subr.bf16.mxu0 %v1747_v22  ;;  %v102_v36 = vand.u32 4294901760, %v45_v24  ;;  %v1763_v40 = vsub.f32 %v35_v8, %v82_v11  ;;  %v1765_v41 = vsub.f32 %v37_v9, %v86_v12  ;;  %v51_v51 = vld [vmem:[#allocation2 + $0xa8] sm:$0xff]  ;;  %v100_v53 = vand.u32 4294901760, %v42_v37  ;;  %v53_v60 = vld [vmem:[#allocation2 + $0xb8] sm:$0xff]  ;;  %v50_v61 = vld [vmem:[#allocation2 + $0xa0] sm:$0xff] }
  0x1a   :  { %2343 = vst [vmem:[#allocation7_spill] sm:$0xff] %v1761_v34  ;;  %v1767_v42 = vsub.f32 %v34_v13, %v84_v26  ;;  %v1769_v43 = vpack.c.bf16 %v94_v30, %v90_v28  ;;  %v1771_v47 = vsub.f32 %v36_v14, %v88_v27  ;;  %v1773_v48 = vsub.f32 %v39_v15, %v90_v28  ;;  %v52_v3 = vld [vmem:[#allocation2 + $0xb0] sm:$0xff]  ;;  %v55_v4 = vld [vmem:[#allocation2 + $0xc8] sm:$0xff]  ;;  %v57_v5 = vld [vmem:[#allocation2 + $0xd8] sm:$0xff] }
  0x1b   :  { %v1775_v49 = vsub.f32 %v41_v17, %v94_v30  ;;  %v1777_v50 = vpack.c.bf16 %v96_v32, %v92_v31  ;;  %v1781_v52 = vsub.f32 %v38_v18, %v92_v31  ;;  %v104_v54 = vand.u32 4294901760, %v44_v38  ;;  %v54_v10 = vld [vmem:[#allocation2 + $0xc0] sm:$0xff]  ;;  %v56_v15 = vld [vmem:[#allocation2 + $0xd0] sm:$0xff]  ;;  %v59_v30 = vld [vmem:[#allocation2 + $0xe8] sm:$0xff] }
  0x1c   :  { %2344 = vst [vmem:[#allocation8_spill] sm:$0xff] %v1767_v42  ;;  %2345 = vst [vmem:[#allocation9_spill] sm:$0xff] %v1769_v43  ;;  %1422 = vmatpush1.bf16.msra.mxu1 %v1761_v34  ;;  %1518 = vmatpush1.bf16.msra.mxu0 %v1761_v34  ;;  %v106_v55 = vand.u32 4294901760, %v47_v39  ;;  %v1785_v56 = vpack.c.bf16 %v102_v36, %v98_v35  ;;  %v110_v57 = vand.u32 4294901760, %v49_v44  ;;  %v108_v58 = vand.u32 4294901760, %v46_v45  ;;  %v61_v31 = vld [vmem:[#allocation2 + $0xf8] sm:$0xff] }
  0x1d   :  { %2346 = vst [vmem:[#allocation10_spill] sm:$0xff] %v1771_v47  ;;  %2347 = vst [vmem:[#allocation11_spill] sm:$0xff] %v1777_v50  ;;  %1424 = vmatprep.subr.bf16.mxu1 %v1769_v43  ;;  %1520 = vmatprep.subr.bf16.mxu0 %v1769_v43  ;;  %v112_v59 = vand.u32 4294901760, %v48_v46  ;;  %v1787_v62 = vsub.f32 %v40_v19, %v96_v32  ;;  %v1789_v63 = vsub.f32 %v43_v23, %v98_v35  ;;  %v58_v32 = vld [vmem:[#allocation2 + $0xe0] sm:$0xff] }
  0x1e   :  { %2348 = vst [vmem:[#allocation12_spill] sm:$0xff] %v1781_v52  ;;  %2349 = vst [vmem:[#allocation13_spill] sm:$0xff] %v1785_v56  ;;  %v1791_v1 = vsub.f32 %v45_v24, %v102_v36  ;;  %v114_v2 = vand.u32 4294901760, %v51_v51  ;;  %v1793_v6 = vpack.c.bf16 %v104_v54, %v100_v53  ;;  %v1795_v7 = vsub.f32 %v42_v37, %v100_v53 }
  0x1f   :  { %2350 = vst [vmem:[#allocation14_spill] sm:$0xff] %v1787_v62  ;;  %v1797_v8 = vsub.f32 %v44_v38, %v104_v54  ;;  %v1799_v9 = vsub.f32 %v47_v39, %v106_v55  ;;  %v1803_v11 = vpack.c.bf16 %v110_v57, %v106_v55  ;;  %v1805_v12 = vsub.f32 %v49_v44, %v110_v57  ;;  %v60_v39 = vld [vmem:[#allocation2 + $0xf0] sm:$0xff]  ;;  %v28_v44 = vld [vmem:[%s2311_s0] sm:$0xff] }
  0x20   :  { %2351 = vst [vmem:[#allocation15_spill] sm:$0xff] %v1793_v6  ;;  %1426 = vmatpush1.bf16.msra.mxu1 %v1777_v50  ;;  %1522 = vmatpush1.bf16.msra.mxu0 %v1777_v50  ;;  %v118_v13 = vand.u32 4294901760, %v53_v60  ;;  %v116_v14 = vand.u32 4294901760, %v50_v61  ;;  %v1809_v17 = vpack.c.bf16 %v112_v59, %v108_v58  ;;  %v120_v18 = vand.u32 4294901760, %v52_v3 }
  0x21   :  { %2352 = vst [vmem:[#allocation16_spill] sm:$0xff] %v1803_v11  ;;  %1428 = vmatprep.subr.bf16.mxu1 %v1785_v56  ;;  %1524 = vmatprep.subr.bf16.mxu0 %v1785_v56  ;;  %v122_v19 = vand.u32 4294901760, %v55_v4  ;;  %v126_v23 = vand.u32 4294901760, %v57_v5  ;;  %v1811_v24 = vsub.f32 %v46_v45, %v108_v58  ;;  %v1813_v26 = vsub.f32 %v48_v46, %v112_v59 }
  0x22   :  { %2353 = vst [vmem:[#allocation17_spill] sm:$0xff] %v1809_v17  ;;  %v1815_v27 = vsub.f32 %v51_v51, %v114_v2  ;;  %v124_v28 = vand.u32 4294901760, %v54_v10  ;;  %v1817_v35 = vpack.c.bf16 %v118_v13, %v114_v2  ;;  %v1819_v36 = vsub.f32 %v53_v60, %v118_v13 }
  0x23   :  { %v1821_v37 = vsub.f32 %v50_v61, %v116_v14  ;;  %v128_v38 = vand.u32 4294901760, %v56_v15  ;;  %v1828_v45 = vpack.c.bf16 %v120_v18, %v116_v14  ;;  %v1830_v46 = vsub.f32 %v52_v3, %v120_v18 }
  0x24   :  { %2354 = vst [vmem:[#allocation18_spill] sm:$0xff] %v1817_v35  ;;  %1430 = vmatpush1.bf16.msra.mxu1 %v1793_v6  ;;  %1526 = vmatpush1.bf16.msra.mxu0 %v1793_v6  ;;  %v1832_v51 = vpack.c.bf16 %v126_v23, %v122_v19  ;;  %v1836_v53 = vsub.f32 %v55_v4, %v122_v19  ;;  %v130_v54 = vand.u32 4294901760, %v59_v30  ;;  %v134_v55 = vand.u32 4294901760, %v61_v31 }
  0x25   :  { %2355 = vst [vmem:[#allocation19_spill] sm:$0xff] %v1828_v45  ;;  %2356 = vst [vmem:[#allocation20_spill] sm:$0xff] %v1830_v46  ;;  %1432 = vmatprep.subr.bf16.mxu1 %v1803_v11  ;;  %1528 = vmatprep.subr.bf16.mxu0 %v1803_v11  ;;  %v132_v57 = vand.u32 4294901760, %v58_v32  ;;  %v136_v58 = vand.u32 4294901760, %v60_v39  ;;  %v195_v59 = vand.u32 4294901760, %v1743_v20  ;;  %v207_v60 = vand.u32 4294901760, %v1750_v25 }
  0x26   :  { %2357 = vst [vmem:[#allocation21_spill] sm:$0xff] %v1832_v51  ;;  %2358 = vst [vmem:[#allocation22_spill] sm:$0xff] %v1836_v53  ;;  %v1840_v61 = vand.u32 4294901760, %v28_v44  ;;  %v1842_v2 = vsub.f32 %v57_v5, %v126_v23  ;;  %v1844_v3 = vpack.c.bf16 %v128_v38, %v124_v28  ;;  %v1846_v13 = vsub.f32 %v54_v10, %v124_v28 }
  0x27   :  { %v1848_v14 = vsub.f32 %v56_v15, %v128_v38  ;;  %v1852_v4 = vsub.f32 %v59_v30, %v130_v54  ;;  %v196_v18 = vsub.f32 %v1743_v20, %v195_v59  ;;  %v208_v19 = vsub.f32 %v1750_v25, %v207_v60 }
  0x28   :  { %2359 = vst [vmem:[#allocation23_spill] sm:$0xff] %v1840_v61  ;;  %2360 = vst [vmem:[#allocation24_spill] sm:$0xff] %v1844_v3  ;;  %1434 = vmatpush1.bf16.msra.mxu1 %v1809_v17  ;;  %1530 = vmatpush1.bf16.msra.mxu0 %v1809_v17  ;;  %v201_v0 = vand.u32 4294901760, %v1754_v29  ;;  %v1859_v5 = vpack.c.bf16 %v134_v55, %v130_v54  ;;  %v1862_v10 = vsub.f32 %v28_v44, %v1840_v61 }
  0x29   :  { %1436 = vmatprep.subr.bf16.mxu1 %v1817_v35  ;;  %1532 = vmatprep.subr.bf16.mxu0 %v1817_v35  ;;  %v213_v15 = vand.u32 4294901760, %v1757_v33  ;;  %v219_v23 = vand.u32 4294901760, %v1763_v40  ;;  %v1866_v28 = vsub.f32 %v61_v31, %v134_v55  ;;  %v1868_v30 = vpack.c.bf16 %v136_v58, %v132_v57 }
  0x2a   :  { %2361 = vst [vmem:[#allocation25_spill] sm:$0xff] %v1859_v5  ;;  %2362 = vst [vmem:[#allocation26_spill] sm:$0xff] %v1862_v10  ;;  %v202_v38 = vsub.f32 %v1754_v29, %v201_v0  ;;  %v231_v17 = vand.u32 4294901760, %v1765_v41  ;;  %v1872_v11 = vsub.f32 %v58_v32, %v132_v57  ;;  %v173_v54 = vand.u32 4294901760, %v1862_v10 }
  0x2b   :  { %2363 = vst [vmem:[#allocation27_spill] sm:$0xff] %v1868_v30  ;;  %v214_v35 = vsub.f32 %v1757_v33, %v213_v15  ;;  %v220_v44 = vsub.f32 %v1763_v40, %v219_v23  ;;  %v197_v31 = vand.u32 4294901760, %v196_v18  ;;  %v209_v55 = vand.u32 4294901760, %v208_v19 }
  0x2c   :  { %1438 = vmatpush1.bf16.msra.mxu1 %v1828_v45  ;;  %1534 = vmatpush1.bf16.msra.mxu0 %v1828_v45  ;;  %v203_v6 = vand.u32 4294901760, %v202_v38  ;;  %v232_v56 = vsub.f32 %v1765_v41, %v231_v17  ;;  %v174_v32 = vsub.f32 %v1862_v10, %v173_v54  ;;  %v225_v43 = vand.u32 4294901760, %v1767_v42 }
  0x2d   :  { %1440 = vmatprep.subr.bf16.mxu1 %v1832_v51  ;;  %1536 = vmatprep.subr.bf16.mxu0 %v1832_v51  ;;  %v215_v57 = vand.u32 4294901760, %v214_v35  ;;  %v221_v50 = vand.u32 4294901760, %v220_v44  ;;  %v237_v22 = vand.u32 4294901760, %v1771_v47  ;;  %v243_v45 = vand.u32 4294901760, %v1773_v48 }
  0x2e   :  { %v233_v34 = vand.u32 4294901760, %v232_v56  ;;  %v255_v18 = vand.u32 4294901760, %v1775_v49  ;;  %v1887_v19 = vsub.f32 %v60_v39, %v136_v58  ;;  %v1543_v38 = vpack.c.bf16 %v207_v60, %v195_v59 }
  0x2f   :  { %v226_v21 = vsub.f32 %v1767_v42, %v225_v43  ;;  %v249_v51 = vand.u32 4294901760, %v1781_v52  ;;  %v1447_v35 = vpack.c.bf16 %v209_v55, %v197_v31  ;;  %v1545_v44 = vpack.c.bf16 %v213_v15, %v201_v0 }
  0x30   :  { %1442 = vmatpush1.bf16.msra.mxu1 %v1844_v3  ;;  %1538 = vmatpush1.bf16.msra.mxu0 %v1844_v3  ;;  %v238_v56 = vsub.f32 %v1771_v47, %v237_v22  ;;  %v261_v10 = vand.u32 4294901760, %v1787_v62  ;;  %v175_v39 = vand.u32 4294901760, %v174_v32  ;;  %v1547_v58 = vpack.c.bf16 %v231_v17, %v219_v23 }
  0x31   :  { %1444 = vmatprep.subr.bf16.mxu1 %v1859_v5  ;;  %1540 = vmatprep.subr.bf16.mxu0 %v1859_v5  ;;  %v244_v59 = vsub.f32 %v1773_v48, %v243_v45  ;;  %v256_v60 = vsub.f32 %v1775_v49, %v255_v18  ;;  %v1449_v42 = vpack.c.bf16 %v215_v57, %v203_v6  ;;  %v227_v15 = vand.u32 4294901760, %v226_v21 }
  0x32   :  { %v1451_v61 = vpack.c.bf16 %v233_v34, %v221_v50  ;;  %v250_v3 = vsub.f32 %v1781_v52, %v249_v51  ;;  %v262_v0 = vsub.f32 %v1787_v62, %v261_v10  ;;  %v239_v31 = vand.u32 4294901760, %v238_v56 }
  0x33   :  { %v267_v55 = vand.u32 4294901760, %v1789_v63  ;;  %v279_v47 = vand.u32 4294901760, %v1791_v1  ;;  %v1549_v17 = vpack.c.bf16 %v237_v22, %v225_v43  ;;  %v245_v23 = vand.u32 4294901760, %v244_v59 }
  0x34   :  { %1446 = vmatpush1.bf16.msra.mxu1 %v1868_v30  ;;  %1542 = vmatpush1.bf16.msra.mxu0 %v1868_v30  ;;  %v1551_v32 = vpack.c.bf16 %v255_v18, %v243_v45  ;;  %v273_v6 = vand.u32 4294901760, %v1795_v7  ;;  %v257_v34 = vand.u32 4294901760, %v256_v60  ;;  %v285_v57 = vand.u32 4294901760, %v1797_v8 }
  0x35   :  { %1448 = vmatprep.subr.bf16.mxu1 %v1447_v35  ;;  %1544 = vmatprep.subr.bf16.mxu0 %v1543_v38  ;;  %v268_v50 = vsub.f32 %v1789_v63, %v267_v55  ;;  %v280_v21 = vsub.f32 %v1791_v1, %v279_v47  ;;  %v251_v56 = vand.u32 4294901760, %v250_v3  ;;  %v263_v5 = vand.u32 4294901760, %v262_v0 }
  0x36   :  { %v1553_v62 = vpack.c.bf16 %v261_v10, %v249_v51  ;;  %v291_v52 = vand.u32 4294901760, %v1799_v9  ;;  %v1453_v22 = vpack.c.bf16 %v239_v31, %v227_v15  ;;  %v274_v43 = vsub.f32 %v1795_v7, %v273_v6 }
  0x37   :  { %176 = vmatmul.mubr.f32.vlgmr.msra.gmra.mrb[0].mxu1 %v175_v39  ;;  %677 = vmatmul.mubr.f32.vlgmr.msra.gmra.mrb[0].mxu0 %v173_v54  ;;  %v286_v45 = vsub.f32 %v1797_v8, %v285_v57  ;;  %v269_v18 = vand.u32 4294901760, %v268_v50  ;;  %v281_v38 = vand.u32 4294901760, %v280_v21  ;;  %v303_v35 = vand.u32 4294901760, %v1805_v12 }
  0x38   :  { %1450 = vmatpush1.bf16.msra.mxu1 %v1449_v42  ;;  %1546 = vmatpush1.bf16.msra.mxu0 %v1545_v44  ;;  %v297_v59 = vand.u32 4294901760, %v1811_v24  ;;  %v1455_v51 = vpack.c.bf16 %v257_v34, %v245_v23  ;;  %v292_v3 = vsub.f32 %v1799_v9, %v291_v52  ;;  %v309_v10 = vand.u32 4294901760, %v1813_v26 }
  0x39   :  { %1452 = vmatprep.subr.bf16.mxu1 %v1451_v61  ;;  %1548 = vmatprep.subr.bf16.mxu0 %v1547_v58  ;;  %v315_v54 = vand.u32 4294901760, %v1815_v27  ;;  %v1457_v39 = vpack.c.bf16 %v263_v5, %v251_v56  ;;  %v304_v60 = vsub.f32 %v1805_v12, %v303_v35  ;;  %v2364_v44 = vmov 0.0  }
  0x3a   :  { %v298_v42 = vsub.f32 %v1811_v24, %v297_v59  ;;  %181 = vmatprep.mubr.f32.mxu1 %v2364_v44  ;;  %682 = vmatprep.mubr.f32.mxu0 %v2364_v44  ;;  %v1555_v0 = vpack.c.bf16 %v279_v47, %v267_v55  ;;  %v275_v15 = vand.u32 4294901760, %v274_v43  ;;  %v287_v61 = vand.u32 4294901760, %v286_v45 }
  0x3b   :  { %v310_v58 = vsub.f32 %v1813_v26, %v309_v10  ;;  %v1459_v31 = vpack.c.bf16 %v281_v38, %v269_v18  ;;  %v316_v23 = vsub.f32 %v1815_v27, %v315_v54  ;;  %v327_v5 = vand.u32 4294901760, %v1819_v36 }
  0x3c   :  { %1454 = vmatpush1.bf16.msra.mxu1 %v1453_v22  ;;  %1550 = vmatpush1.bf16.msra.mxu0 %v1549_v17  ;;  %v321_v34 = vand.u32 4294901760, %v1821_v37  ;;  %v293_v50 = vand.u32 4294901760, %v292_v3  ;;  %v305_v21 = vand.u32 4294901760, %v304_v60  ;;  %v333_v56 = vand.u32 4294901760, %v1830_v46 }
  0x3d   :  { %1456 = vmatprep.subr.bf16.mxu1 %v1455_v51  ;;  %1552 = vmatprep.subr.bf16.mxu0 %v1551_v32  ;;  %v339_v47 = vand.u32 4294901760, %v1836_v53  ;;  %v1557_v55 = vpack.c.bf16 %v285_v57, %v273_v6  ;;  %v299_v43 = vand.u32 4294901760, %v298_v42  ;;  %v311_v45 = vand.u32 4294901760, %v310_v58 }
  0x3e   :  { %v328_v17 = vsub.f32 %v1819_v36, %v327_v5  ;;  %v1461_v22 = vpack.c.bf16 %v287_v61, %v275_v15  ;;  %v322_v18 = vsub.f32 %v1821_v37, %v321_v34  ;;  %v334_v38 = vsub.f32 %v1830_v46, %v333_v56  ;;  %v29_v61 = vld [vmem:[%s2311_s0 + $0x8] sm:$0xff] }
  0x3f   :  { %v340_v30 = vsub.f32 %v1836_v53, %v339_v47  ;;  %v317_v32 = vand.u32 4294901760, %v316_v23  ;;  %v351_v3 = vand.u32 4294901760, %v1842_v2  ;;  %v345_v60 = vand.u32 4294901760, %v1846_v13 }
  0x40   :  { %1458 = vmatpush1.bf16.msra.mxu1 %v1457_v39  ;;  %1554 = vmatpush1.bf16.msra.mxu0 %v1553_v62  ;;  %v329_v51 = vand.u32 4294901760, %v328_v17  ;;  %v1463_v6 = vpack.c.bf16 %v305_v21, %v293_v50  ;;  %v1559_v57 = vpack.c.bf16 %v303_v35, %v291_v52  ;;  %v357_v42 = vand.u32 4294901760, %v1848_v14 }
  0x41   :  { %1460 = vmatprep.subr.bf16.mxu1 %v1459_v31  ;;  %1556 = vmatprep.subr.bf16.mxu0 %v1555_v0  ;;  %v363_v15 = vand.u32 4294901760, %v1852_v4  ;;  %v1465_v39 = vpack.c.bf16 %v311_v45, %v299_v43  ;;  %v1561_v62 = vpack.c.bf16 %v309_v10, %v297_v59  ;;  %v1563_v58 = vpack.c.bf16 %v327_v5, %v315_v54 }
  0x42   :  { %v352_v23 = vsub.f32 %v1842_v2, %v351_v3  ;;  %v323_v17 = vand.u32 4294901760, %v322_v18  ;;  %v335_v53 = vand.u32 4294901760, %v334_v38  ;;  %v341_v46 = vand.u32 4294901760, %v340_v30 }
  0x43   :  { %v346_v0 = vsub.f32 %v1846_v13, %v345_v60  ;;  %v1467_v52 = vpack.c.bf16 %v329_v51, %v317_v32  ;;  %v358_v35 = vsub.f32 %v1848_v14, %v357_v42  ;;  %v375_v31 = vand.u32 4294901760, %v1866_v28 }
  0x44   :  { %1462 = vmatpush1.bf16.msra.mxu1 %v1461_v22  ;;  %1558 = vmatpush1.bf16.msra.mxu0 %v1557_v55  ;;  %v1942_v50 = vand.u32 4294901760, %v29_v61  ;;  %v353_v59 = vand.u32 4294901760, %v352_v23  ;;  %v364_v10 = vsub.f32 %v1852_v4, %v363_v15  ;;  %v369_v54 = vand.u32 4294901760, %v1872_v11 }
  0x45   :  { %1464 = vmatprep.subr.bf16.mxu1 %v1463_v6  ;;  %1560 = vmatprep.subr.bf16.mxu0 %v1559_v57  ;;  %v381_v30 = vand.u32 4294901760, %v1887_v19  ;;  %v376_v5 = vsub.f32 %v1866_v28, %v375_v31  ;;  %v1469_v55 = vpack.c.bf16 %v335_v53, %v323_v17  ;;  %v1565_v43 = vpack.c.bf16 %v333_v56, %v321_v34 }
  0x46   :  { %v1949_v21 = vsub.f32 %v29_v61, %v1942_v50  ;;  %v347_v45 = vand.u32 4294901760, %v346_v0  ;;  %v359_v22 = vand.u32 4294901760, %v358_v35  ;;  %v370_v38 = vsub.f32 %v1872_v11, %v369_v54  ;;  %v2366_v0 = vld [vmem:[#allocation5_spill] sm:$0xff]  ;;  %v2369_v35 = vld [vmem:[#allocation6_spill] sm:$0xff] }
  0x47   :  { %v382_v32 = vsub.f32 %v1887_v19, %v381_v30  ;;  %v1471_v51 = vpack.c.bf16 %v353_v59, %v341_v46  ;;  %v1567_v6 = vpack.c.bf16 %v351_v3, %v339_v47  ;;  %v365_v57 = vand.u32 4294901760, %v364_v10  ;;  %v2375_v10 = vld [vmem:[#allocation13_spill] sm:$0xff] }
  0x48   :  { %1466 = vmatpush1.bf16.msra.mxu1 %v1465_v39  ;;  %1562 = vmatpush1.bf16.msra.mxu0 %v1561_v62  ;;  %v184_v18 = vand.u32 4294901760, %v1949_v21  ;;  %v377_v23 = vand.u32 4294901760, %v376_v5  ;;  %v1569_v53 = vpack.c.bf16 %v357_v42, %v345_v60  ;;  %v1473_v34 = vpack.c.bf16 %v359_v22, %v347_v45  ;;  %v2386_v22 = vld [vmem:[#allocation27_spill] sm:$0xff] }
  0x49   :  { %1468 = vmatprep.subr.bf16.mxu1 %v1467_v52  ;;  %1564 = vmatprep.subr.bf16.mxu0 %v1563_v58  ;;  %v371_v39 = vand.u32 4294901760, %v370_v38  ;;  %v383_v62 = vand.u32 4294901760, %v382_v32  ;;  %v1571_v58 = vpack.c.bf16 %v375_v31, %v363_v15  ;;  %v1573_v47 = vpack.c.bf16 %v381_v30, %v369_v54  ;;  %v2365_v15 = vld [vmem:[#allocation23_spill] sm:$0xff]  ;;  %v2367_v52 = vld [vmem:[#allocation8_spill] sm:$0xff]  ;;  %v2373_v31 = vld [vmem:[#allocation9_spill] sm:$0xff] }
  0x4a   :  { %v185_v61 = vsub.f32 %v1949_v21, %v184_v18  ;;  %686 = vmatmul.mubr.f32.gmra.mrb[2].mxu0 %v184_v18  ;;  %v1475_v17 = vpack.c.bf16 %v377_v23, %v365_v57  ;;  %v1479_v3 = vpack.c.bf16 %v1750_v25, %v1743_v20  ;;  %v1481_v60 = vpack.c.bf16 %v1757_v33, %v1754_v29  ;;  %v2368_v20 = vld [vmem:[#allocation10_spill] sm:$0xff]  ;;  %v2371_v33 = vld [vmem:[#allocation12_spill] sm:$0xff]  ;;  %v2376_v30 = vld [vmem:[#allocation15_spill] sm:$0xff] }
  0x4b   :  { %852 = vmatprep.mubr.f32.mxu0 %v2364_v44  ;;  %v1477_v46 = vpack.c.bf16 %v383_v62, %v371_v39  ;;  %v1483_v42 = vpack.c.bf16 %v1765_v41, %v1763_v40  ;;  %v1485_v25 = vpack.c.bf16 %v2368_v20, %v2367_v52  ;;  %v1487_v29 = vpack.c.bf16 %v1775_v49, %v1773_v48  ;;  %v2372_v40 = vld [vmem:[#allocation14_spill] sm:$0xff]  ;;  %v2374_v49 = vld [vmem:[#allocation11_spill] sm:$0xff] }
  0x4c   :  { %1470 = vmatpush1.bf16.msra.mxu1 %v1469_v55  ;;  %1566 = vmatpush1.bf16.msra.mxu0 %v1565_v43  ;;  %v186_v56 = vand.u32 4294901760, %v185_v61  ;;  %v1489_v41 = vpack.c.bf16 %v2372_v40, %v2371_v33  ;;  %v1491_v48 = vpack.c.bf16 %v1791_v1, %v1789_v63  ;;  %v1493_v59 = vpack.c.bf16 %v1797_v8, %v1795_v7  ;;  %v2377_v1 = vld [vmem:[#allocation16_spill] sm:$0xff]  ;;  %v2378_v7 = vld [vmem:[#allocation17_spill] sm:$0xff]  ;;  %v2387_v18 = vld [vmem:[#allocation26_spill] sm:$0xff] }
  0x4d   :  { %1472 = vmatprep.subr.bf16.mxu1 %v1471_v51  ;;  %1568 = vmatprep.subr.bf16.mxu0 %v1567_v6  ;;  %v1495_v54 = vpack.c.bf16 %v1805_v12, %v1799_v9  ;;  %v1497_v63 = vpack.c.bf16 %v1813_v26, %v1811_v24  ;;  %v1499_v5 = vpack.c.bf16 %v1819_v36, %v1815_v27  ;;  %v2379_v8 = vld [vmem:[#allocation20_spill] sm:$0xff]  ;;  %v2380_v9 = vld [vmem:[#allocation18_spill] sm:$0xff]  ;;  %v2382_v24 = vld [vmem:[#allocation19_spill] sm:$0xff] }
  0x4e   :  { %187 = vmatmul.mubr.f32.gmra.mrb[2].mxu1 %v186_v56  ;;  %v1501_v55 = vpack.c.bf16 %v2379_v8, %v1821_v37  ;;  %v2381_v12 = vld [vmem:[#allocation22_spill] sm:$0xff]  ;;  %v1505_v26 = vpack.c.bf16 %v1848_v14, %v1846_v13  ;;  %v2383_v27 = vld [vmem:[#allocation21_spill] sm:$0xff]  ;;  %v1507_v36 = vpack.c.bf16 %v1866_v28, %v1852_v4  ;;  %v2384_v37 = vld [vmem:[#allocation24_spill] sm:$0xff]  ;;  %v1509_v45 = vpack.c.bf16 %v1887_v19, %v1872_v11 }
  0x4f   :  { %417 = vmatprep.mubr.f32.mxu1 %v2364_v44  ;;  %v1503_v43 = vpack.c.bf16 %v1842_v2, %v2381_v12  ;;  %v2385_v2 = vld [vmem:[#allocation25_spill] sm:$0xff]  ;;  %v64_v13 = vlaneseq }
  0x50   :  { %1474 = vmatpush1.bf16.msra.mxu1 %v1473_v34  ;;  %1570 = vmatpush1.bf16.msra.mxu0 %v1569_v53  ;;  %v62_v4 = vld [vmem:[%s2313_s2] sm:$0x3] }
  0x51   :  { %1476 = vmatprep.subr.bf16.mxu1 %v1475_v17  ;;  %1572 = vmatprep.subr.bf16.mxu0 %v1571_v58  ;;  %v65_v11 = vshrl.u32 %v64_v13, 7 }
  0x53   :  { %v66_v14 = vsub.s32 0, %v65_v11  ;;  %v70_v28 = vsub.s32 1, %v65_v11  ;;  %v1706_v11 = vmov 1326507024  }
  0x54   :  { %1478 = vmatpush1.bf16.msra.mxu1 %v1477_v46  ;;  %1574 = vmatpush1.bf16.msra.mxu0 %v1573_v47 }
  0x55   :  { %1480 = vmatprep.subr.bf16.mxu1 %v1479_v3  ;;  %1576 = vmatprep.subr.bf16.mxu0 %v1741_v16  ;;  %v2370_v16 = vld [vmem:[#allocation7_spill] sm:$0xff]  ;;  %v67_v19 = vrot.slane %v62_v4, %v66_v14  ;;  %v71_v38 = vrot.slane %v62_v4, %v70_v28 }
  0x57   :  { %419 = vmatmul.mubr.f32.vlgmr.msra.gmra.mrb[0].mxu1 %v2365_v15  ;;  %854 = vmatmul.mubr.f32.vlgmr.msra.gmra.mrb[0].mxu0 %v2365_v15 }
  0x58   :  { %1482 = vmatpush1.bf16.msra.mxu1 %v1481_v60  ;;  %1578 = vmatpush1.bf16.msra.mxu0 %v2366_v0 }
  0x59   :  { %1484 = vmatprep.subr.bf16.mxu1 %v1483_v42  ;;  %1580 = vmatprep.subr.bf16.mxu0 %v2369_v35 }
  0x5a   :  { %424 = vmatprep.mubr.f32.mxu1 %v2364_v44  ;;  %859 = vmatprep.mubr.f32.mxu0 %v2364_v44 }
  0x5b   :  { %426 = vmatmul.mubr.f32.gmra.mrb[2].mxu1 %v1942_v50  ;;  %861 = vmatmul.mubr.f32.gmra.mrb[2].mxu0 %v1942_v50 }
  0x5c   :  { %1486 = vmatpush1.bf16.msra.mxu1 %v1485_v25  ;;  %1582 = vmatpush1.bf16.msra.mxu0 %v2370_v16 }
  0x5d   :  { %1488 = vmatprep.subr.bf16.mxu1 %v1487_v29  ;;  %1584 = vmatprep.subr.bf16.mxu0 %v2373_v31 }
  0x5e   :  { %560 = vmatprep.mubr.f32.mxu1 %v2364_v44  ;;  %963 = vmatprep.mubr.f32.mxu0 %v2364_v44 }
  0x60   :  { %1490 = vmatpush1.bf16.msra.mxu1 %v1489_v41  ;;  %1586 = vmatpush1.bf16.msra.mxu0 %v2374_v49 }
  0x61   :  { %1492 = vmatprep.subr.bf16.mxu1 %v1491_v48  ;;  %1588 = vmatprep.subr.bf16.mxu0 %v2375_v10 }
  0x64   :  { %1494 = vmatpush1.bf16.msra.mxu1 %v1493_v59  ;;  %1590 = vmatpush1.bf16.msra.mxu0 %v2376_v30 }
  0x65   :  { %1496 = vmatprep.subr.bf16.mxu1 %v1495_v54  ;;  %1592 = vmatprep.subr.bf16.mxu0 %v2377_v1 }
  0x68   :  { %1498 = vmatpush1.bf16.msra.mxu1 %v1497_v63  ;;  %1594 = vmatpush1.bf16.msra.mxu0 %v2378_v7 }
  0x69   :  { %1500 = vmatprep.subr.bf16.mxu1 %v1499_v5  ;;  %1596 = vmatprep.subr.bf16.mxu0 %v2380_v9  ;;  %v1701_v5 = vmov 683565275   ;;  %v1702_v9 = vmov 2475754826  }
  0x6c   :  { %1502 = vmatpush1.bf16.msra.mxu1 %v1501_v55  ;;  %1598 = vmatpush1.bf16.msra.mxu0 %v2382_v24 }
  0x6d   :  { %1504 = vmatprep.subr.bf16.mxu1 %v1503_v43  ;;  %1600 = vmatprep.subr.bf16.mxu0 %v2383_v27  ;;  %v1703_v43 = vmov 2131351028  }
  0x70   :  { %1506 = vmatpush1.bf16.msra.mxu1 %v1505_v26  ;;  %1602 = vmatpush1.bf16.msra.mxu0 %v2384_v37  ;;  %v1704_v26 = vmov 2102212464  }
  0x71   :  { %1508 = vmatprep.subr.bf16.mxu1 %v1507_v36  ;;  %1604 = vmatprep.subr.bf16.mxu0 %v2385_v2  ;;  %v1705_v36 = vmov 920167782  }
  0x74   :  { %1510 = vmatpush1.bf16.msra.mxu1 %v1509_v45  ;;  %1606 = vmatpush1.bf16.msra.mxu0 %v2386_v22 }
  0x77   :  { %563 = vmatmul.mubr.f32.vlgmr.msra.gmra.mrb[0].mxu1 %v2387_v18  ;;  %965 = vmatmul.mubr.f32.vlgmr.msra.gmra.mrb[0].mxu0 %v2365_v15 }
  0x78   :  { %568 = vmatprep.mubr.f32.mxu1 %v2364_v44  ;;  %970 = vmatprep.mubr.f32.mxu0 %v2364_v44 }
  0x7b   :  { %571 = vmatmul.mubr.f32.gmra.mrb[2].mxu1 %v1949_v21  ;;  %972 = vmatmul.mubr.f32.gmra.mrb[2].mxu0 %v1942_v50 }
 0x14a   :  { %v564_v32 = vpop.f32.mrb[0].mxu1  ;;  %v966_v51 = vpop.f32.mrb[0].mxu0 }
 0x14b   :  { %v1607_v6 = vadd.f32 %v564_v32, %v67_v19  ;;  %v566_v57 = vpop.f32.mrb[1].mxu1  ;;  %v968_v23 = vpop.f32.mrb[1].mxu0 }
 0x14c   :  { %v1609_v44 = vadd.f32 %v566_v57, %v71_v38 }
 0x14d   :  { %v2022_v61 = vadd.f32 %v1607_v6, %v966_v51 }
 0x14e   :  { %v2024_v21 = vadd.f32 %v1609_v44, %v968_v23  ;;  %v572_v50 = vpop.f32.mrb[2].mxu1  ;;  %v973_v53 = vpop.f32.mrb[2].mxu0 }
 0x14f   :  { %v978_v34 = vand.u32 2147483647, %v2022_v61  ;;  %v981_v56 = vand.u32 2139095040, %v2022_v61  ;;  %v574_v39 = vpop.f32.mrb[3].mxu1  ;;  %v975_v62 = vpop.f32.mrb[3].mxu0  ;;  %v1611_v47 = vadd.f32 %v572_v50, %v67_v19  ;;  %vm980_vm13 = vcmp.lt.s32.totalorder %v2022_v61, 0 }
 0x150   :  { %v1081_v17 = vand.u32 2147483647, %v2024_v21  ;;  %v1084_v58 = vand.u32 2139095040, %v2024_v21  ;;  %v1613_v15 = vadd.f32 %v574_v39, %v71_v38 }
 0x151   :  { %v982_v46 = vshrl.u32 %v981_v56, 23  ;;  %v985_v3 = vand.u32 8388607, %v978_v34  ;;  %v2034_v52 = vadd.f32 %v1611_v47, %v973_v53 }
 0x152   :  { %v1085_v60 = vshrl.u32 %v1084_v58, 23  ;;  %v1088_v42 = vand.u32 8388607, %v1081_v17  ;;  %v2036_v25 = vadd.f32 %v1613_v15, %v975_v62 }
 0x153   :  { %v1399_v0 = vadd.s32 4294967169, %v982_v46  ;;  %v986_v29 = vor.u32 8388608, %v985_v3  ;;  %v1187_v40 = vand.u32 2139095040, %v2034_v52  ;;  %v1184_v63 = vand.u32 2147483647, %v2034_v52 }
 0x154   :  { %v1403_v20 = vadd.s32 4294967169, %v1085_v60  ;;  %v1089_v16 = vor.u32 8388608, %v1088_v42 }
 0x155   :  { %v988_v35 = vadd.s32 1, %v1399_v0  ;;  %v1188_v31 = vshrl.u32 %v1187_v40, 23  ;;  %v2039_v10 = vshll.u32 %v986_v29, 8 }
 0x156   :  { %v1091_v33 = vadd.s32 1, %v1403_v20  ;;  %v2043_v30 = vshll.u32 %v1089_v16, 8 }
 0x157   :  { %vm989_vm0 = vcmp.gt.s32.totalorder %v988_v35, 0  ;;  %v2047_v55 = vadd.s32 4294967169, %v1188_v31 }
 0x158   :  { %v990_v41 = vsel %vm989_vm0, %v988_v35, 0  ;;  %vm1092_vm1 = vcmp.gt.s32.totalorder %v1091_v33, 0 }
 0x159   :  { %v991_v48 = vshrl.u32 %v990_v41, 5  ;;  %v992_v49 = vand.u32 31, %v990_v41  ;;  %v1093_v59 = vsel %vm1092_vm1, %v1091_v33, 0 }
 0x15a   :  { %v2041_v54 = vshrl.u32 %v1093_v59, 5  ;;  %v1095_v8 = vand.u32 31, %v1093_v59 }
 0x15b   :  { %v993_v1 = vsub.s32 32, %v992_v49  ;;  %v995_v7 = vshll.u32 %v1701_v5, %v992_v49  ;;  %v998_v12 = vshll.u32 %v1702_v9, %v992_v49  ;;  %v1001_v24 = vshll.u32 %v1703_v43, %v992_v49 }
 0x15c   :  { %v1004_v27 = vshll.u32 %v1704_v26, %v992_v49  ;;  %v1007_v37 = vshll.u32 %v1705_v36, %v992_v49  ;;  %vm1010_vm2 = vcmp.lt.s32.totalorder %v991_v48, 1  ;;  %vm1011_vm3 = vcmp.lt.s32.totalorder %v991_v48, 2 }
 0x15d   :  { %v996_v45 = vshrl.u32 %v1702_v9, %v993_v1  ;;  %v999_v2 = vshrl.u32 %v1703_v43, %v993_v1  ;;  %v1002_v22 = vshrl.u32 %v1704_v26, %v993_v1  ;;  %v994_v18 = vshrl.u32 %v1701_v5, %v993_v1 }
 0x15e   :  { %v1005_v13 = vshrl.u32 %v1705_v36, %v993_v1  ;;  %v1008_v14 = vshrl.u32 %v1706_v11, %v993_v1  ;;  %v1096_v38 = vsub.s32 32, %v1095_v8  ;;  %vm1012_vm4 = vcmp.lt.s32.totalorder %v991_v48, 3 }
 0x15f   :  { %v997_v4 = vor.u32 %v996_v45, %v995_v7  ;;  %v1000_v28 = vor.u32 %v999_v2, %v998_v12  ;;  %v1003_v19 = vor.u32 %v1002_v22, %v1001_v24  ;;  %vm1013_vm5 = vcmp.lt.s32.totalorder %v991_v48, 4 }
 0x160   :  { %v1006_v32 = vor.u32 %v1005_v13, %v1004_v27  ;;  %v1009_v51 = vor.u32 %v1008_v14, %v1007_v37  ;;  %v1098_v39 = vshll.u32 %v1701_v5, %v1095_v8  ;;  %v1099_v46 = vshrl.u32 %v1702_v9, %v1096_v38 }
 0x161   :  { %v1014_v6 = vsel %vm1010_vm2, %v994_v18, %v997_v4  ;;  %v1015_v57 = vsel %vm1013_vm5, %v1003_v19, 2102212464  ;;  %v1018_v23 = vsel %vm1010_vm2, %v997_v4, %v1000_v28  ;;  %v1022_v44 = vsel %vm1010_vm2, %v1000_v28, %v1003_v19 }
 0x162   :  { %v1016_v50 = vsel %vm1012_vm4, %v1000_v28, %v1015_v57  ;;  %v1019_v53 = vsel %vm1013_vm5, %v1006_v32, 920167782  ;;  %v1023_v56 = vsel %vm1013_vm5, %v1009_v51, 1326507024  ;;  %v1101_v47 = vshll.u32 %v1702_v9, %v1095_v8 }
 0x163   :  { %v1020_v62 = vsel %vm1012_vm4, %v1003_v19, %v1019_v53  ;;  %v1024_v58 = vsel %vm1012_vm4, %v1006_v32, %v1023_v56  ;;  %v1017_v3 = vsel %vm1011_vm3, %v1014_v6, %v1016_v50  ;;  %v1102_v15 = vshrl.u32 %v1703_v43, %v1096_v38 }
 0x164   :  { %v1021_v60 = vsel %vm1011_vm3, %v1018_v23, %v1020_v62  ;;  %v1025_v42 = vsel %vm1011_vm3, %v1022_v44, %v1024_v58  ;;  %v1100_v16 = vor.u32 %v1099_v46, %v1098_v39  ;;  %v1104_v40 = vshll.u32 %v1703_v43, %v1095_v8 }
 0x165   :  { %v2070_v0 = vmul.u32.u64.low %v2039_v10, %v1025_v42  ;;  %v2071_v20 = vmul.u32.u64.high %v2039_v10, %v1025_v42, %v2070_v0  ;;  %v2074_v35 = vmul.u32.u64.low %v2039_v10, %v1021_v60  ;;  %v2075_v29 = vmul.u32.u64.high %v2039_v10, %v1021_v60, %v2074_v35 }
 0x166   :  { %v1103_v33 = vor.u32 %v1102_v15, %v1101_v47  ;;  %v1105_v41 = vshrl.u32 %v1704_v26, %v1096_v38  ;;  %v1097_v31 = vshrl.u32 %v1701_v5, %v1096_v38  ;;  %v1107_v48 = vshll.u32 %v1704_v26, %v1095_v8 }
 0x167   :  { %v1108_v49 = vshrl.u32 %v1705_v36, %v1096_v38  ;;  %v1111_v59 = vshrl.u32 %v1706_v11, %v1096_v38  ;;  %v1033_v1 = vmul.u32 %v2039_v10, %v1017_v3  ;;  %v1110_v12 = vshll.u32 %v1705_v36, %v1095_v8 }
 0x168   :  { %v1106_v7 = vor.u32 %v1105_v41, %v1104_v40  ;;  %vm1113_vm6 = vcmp.lt.s32.totalorder %v2041_v54, 1  ;;  %vm1035_vm7 = vc.u32 %v2071_v20, %v2074_v35  ;;  %v1036_v24 = vadd.s32 1, %v2075_v29 }
 0x169   :  { %v1109_v27 = vor.u32 %v1108_v49, %v1107_v48  ;;  %vm1114_vm8 = vcmp.lt.s32.totalorder %v2041_v54, 2  ;;  %v1112_v37 = vor.u32 %v1111_v59, %v1110_v12  ;;  %vm1115_vm9 = vcmp.lt.s32.totalorder %v2041_v54, 3 }
 0x16a   :  { %vm1116_vm10 = vcmp.lt.s32.totalorder %v2041_v54, 4  ;;  %v1121_v45 = vsel %vm1113_vm6, %v1100_v16, %v1103_v33  ;;  %v1037_v10 = vsel %vm1035_vm7, %v1036_v24, %v2075_v29  ;;  %v1125_v8 = vsel %vm1113_vm6, %v1103_v33, %v1106_v7 }
 0x16b   :  { %v1118_v2 = vsel %vm1116_vm10, %v1106_v7, 2102212464  ;;  %v1122_v22 = vsel %vm1116_vm10, %v1109_v27, 920167782  ;;  %v1038_v18 = vadd.s32 %v1037_v10, %v1033_v1  ;;  %v1117_v13 = vsel %vm1113_vm6, %v1097_v31, %v1100_v16 }
 0x16c   :  { %v1123_v14 = vsel %vm1115_vm9, %v1106_v7, %v1122_v22  ;;  %v1126_v4 = vsel %vm1116_vm10, %v1112_v37, 1326507024  ;;  %v1119_v28 = vsel %vm1115_vm9, %v1103_v33, %v1118_v2  ;;  %v1194_v32 = vadd.s32 1, %v2047_v55 }
 0x16d   :  { %v1124_v19 = vsel %vm1114_vm8, %v1121_v45, %v1123_v14  ;;  %v1127_v38 = vsel %vm1115_vm9, %v1109_v27, %v1126_v4  ;;  %v1039_v51 = vadd.s32 536870912, %v1038_v18  ;;  %v1191_v53 = vand.u32 8388607, %v1184_v63 }
 0x16e   :  { %v1128_v6 = vsel %vm1114_vm8, %v1125_v8, %v1127_v38  ;;  %v2098_v57 = vmul.u32.u64.low %v2043_v30, %v1124_v19  ;;  %v2099_v23 = vmul.u32.u64.high %v2043_v30, %v1124_v19, %v2098_v57  ;;  %vm1195_vm11 = vcmp.gt.s32.totalorder %v1194_v32, 0 }
 0x16f   :  { %v2103_v44 = vmul.u32.u64.low %v2043_v30, %v1128_v6  ;;  %v2104_v50 = vmul.u32.u64.high %v2043_v30, %v1128_v6, %v2103_v44  ;;  %v2108_v56 = vshrl.u32 %v1039_v51, 30  ;;  %v1120_v55 = vsel %vm1114_vm8, %v1117_v13, %v1119_v28 }
 0x170   :  { %v1196_v39 = vsel %vm1195_vm11, %v1194_v32, 0  ;;  %v1139_v46 = vadd.s32 1, %v2099_v23  ;;  %v1136_v47 = vmul.u32 %v2043_v30, %v1120_v55  ;;  %v1192_v3 = vor.u32 8388608, %v1191_v53 }
 0x171   :  { %v1198_v62 = vand.u32 31, %v1196_v39  ;;  %v1041_v58 = vshll.u32 %v2108_v56, 30  ;;  %vm1138_vm12 = vc.u32 %v2104_v50, %v2098_v57  ;;  %v1287_v54 = vand.u32 2147483647, %v2036_v25 }
 0x172   :  { %v1140_v15 = vsel %vm1138_vm12, %v1139_v46, %v2099_v23  ;;  %v1034_v16 = vadd.s32 %v2074_v35, %v2071_v20  ;;  %v2121_v41 = vshll.u32 %v1192_v3, 8  ;;  %v1290_v49 = vand.u32 2139095040, %v2036_v25 }
 0x173   :  { %v1199_v60 = vsub.s32 32, %v1198_v62  ;;  %v1042_v42 = vsub.s32 %v1038_v18, %v1041_v58  ;;  %v1141_v0 = vadd.s32 %v1140_v15, %v1136_v47  ;;  %v1197_v1 = vshrl.u32 %v1196_v39, 5 }
 0x174   :  { %v1207_v7 = vshll.u32 %v1703_v43, %v1198_v62  ;;  %v1201_v35 = vshll.u32 %v1701_v5, %v1198_v62  ;;  %v1204_v24 = vshll.u32 %v1702_v9, %v1198_v62  ;;  %v1210_v27 = vshll.u32 %v1704_v26, %v1198_v62 }
 0x175   :  { %v1044_v29 = vsub.s32 0, %v1042_v42  ;;  %v1142_v33 = vadd.s32 536870912, %v1141_v0  ;;  %v1208_v40 = vshrl.u32 %v1704_v26, %v1199_v60  ;;  %v1202_v31 = vshrl.u32 %v1702_v9, %v1199_v60 }
 0x176   :  { %v1205_v48 = vshrl.u32 %v1703_v43, %v1199_v60  ;;  %v1211_v12 = vshrl.u32 %v1705_v36, %v1199_v60  ;;  %v1064_v37 = vsub.s32 4, %v2108_v56  ;;  %v1214_v2 = vshrl.u32 %v1706_v11, %v1199_v60 }
 0x177   :  { %v1400_v30 = vmin.u32 %v1044_v29, %v1042_v42  ;;  %v2126_v59 = vshrl.u32 %v1142_v33, 30  ;;  %v1209_v10 = vor.u32 %v1208_v40, %v1207_v7  ;;  %v1203_v8 = vor.u32 %v1202_v31, %v1201_v35 }
 0x178   :  { %v1206_v18 = vor.u32 %v1205_v48, %v1204_v24  ;;  %v1212_v13 = vor.u32 %v1211_v12, %v1210_v27  ;;  %v1200_v4 = vshrl.u32 %v1701_v5, %v1199_v60  ;;  %v1213_v28 = vshll.u32 %v1705_v36, %v1198_v62 }
 0x179   :  { %v1046_v20 = vclz %v1400_v30  ;;  %v1144_v45 = vshll.u32 %v2126_v59, 30  ;;  %v1291_v19 = vshrl.u32 %v1290_v49, 23  ;;  %vm1216_vm15 = vcmp.lt.s32.totalorder %v1197_v1, 1 }
 0x17a   :  { %vm1217_vm0 = vcmp.lt.s32.totalorder %v1197_v1, 2  ;;  %vm1219_vm1 = vcmp.lt.s32.totalorder %v1197_v1, 4  ;;  %v1215_v51 = vor.u32 %v1214_v2, %v1213_v28  ;;  %v1224_v53 = vsel %vm1216_vm15, %v1203_v8, %v1206_v18 }
 0x17b   :  { %v1401_v22 = vadd.s32 4294967294, %v1046_v20  ;;  %v2136_v14 = vsub.s32 %v1141_v0, %v1144_v45  ;;  %v1221_v6 = vsel %vm1219_vm1, %v1209_v10, 2102212464  ;;  %v1225_v55 = vsel %vm1219_vm1, %v1212_v13, 920167782 }
 0x17c   :  { %vm1218_vm2 = vcmp.lt.s32.totalorder %v1197_v1, 3  ;;  %v1220_v58 = vsel %vm1216_vm15, %v1200_v4, %v1203_v8  ;;  %v1228_v60 = vsel %vm1216_vm15, %v1206_v18, %v1209_v10  ;;  %v1229_v33 = vsel %vm1219_vm1, %v1215_v51, 1326507024 }
 0x17d   :  { %vm1402_vm14 = vcmp.lt.s32.totalorder %v1401_v22, 0  ;;  %v1147_v32 = vsub.s32 0, %v2136_v14  ;;  %v1226_v3 = vsel %vm1218_vm2, %v1209_v10, %v1225_v55  ;;  %v1222_v0 = vsel %vm1218_vm2, %v1206_v18, %v1221_v6 }
 0x17e   :  { %v1049_v38 = vsel %vm1402_vm14, 0, %v1401_v22  ;;  %v1227_v29 = vsel %vm1217_vm0, %v1224_v53, %v1226_v3  ;;  %v1230_v31 = vsel %vm1218_vm2, %v1212_v13, %v1229_v33  ;;  %v1223_v20 = vsel %vm1217_vm0, %v1220_v58, %v1222_v0 }
 0x17f   :  { %v1050_v23 = vsub.s32 32, %v1049_v38  ;;  %v1054_v44 = vsub.s32 4294967266, %v1049_v38  ;;  %v1051_v39 = vshll.u32 %v1042_v42, %v1049_v38  ;;  %v1404_v62 = vmin.u32 %v1147_v32, %v2136_v14 }
 0x180   :  { %v1411_v42 = vadd.s32 4294967169, %v1291_v19  ;;  %v1231_v49 = vsel %vm1217_vm0, %v1228_v60, %v1230_v31  ;;  %v1065_v27 = vsel %vm980_vm13, %v1064_v37, %v2108_v56  ;;  %v1137_v45 = vadd.s32 %v2098_v57, %v2104_v50 }
 0x181   :  { %v1052_v46 = vshrl.u32 %v1034_v16, %v1050_v23  ;;  %v1055_v47 = vadd.s32 127, %v1054_v44  ;;  %v1149_v15 = vclz %v1404_v62  ;;  %v1167_v18 = vsub.s32 4, %v2126_v59 }
 0x182   :  { %v2152_v7 = vmul.u32.u64.low %v2121_v41, %v1227_v29  ;;  %v2153_v16 = vmul.u32.u64.high %v2121_v41, %v1227_v29, %v2152_v7  ;;  %v2158_v35 = vmul.u32.u64.low %v2121_v41, %v1231_v49  ;;  %v2159_v24 = vmul.u32.u64.high %v2121_v41, %v1231_v49, %v2158_v35 }
 0x183   :  { %v1053_v40 = vor.u32 %v1052_v46, %v1051_v39  ;;  %v1056_v30 = vshll.u32 %v1055_v47, 23  ;;  %v1405_v48 = vadd.s32 4294967294, %v1149_v15  ;;  %v1297_v10 = vadd.s32 1, %v1411_v42 }
 0x184   :  { %v1239_v4 = vmul.u32 %v2121_v41, %v1223_v20  ;;  %v1242_v28 = vadd.s32 1, %v2153_v16  ;;  %vm1241_vm4 = vc.u32 %v2159_v24, %v2152_v7  ;;  %vm2175_vm6 = vcmp.le.f32.partialorder %v978_v34, 0.7853982 }
 0x185   :  { %v1057_v12 = vor.u32 4788187, %v1056_v30  ;;  %vm1406_vm3 = vcmp.lt.s32.totalorder %v1405_v48, 0  ;;  %v1060_v22 = vcvt.s32.f32 %v1053_v40  ;;  %vm1298_vm5 = vcmp.gt.s32.totalorder %v1297_v10, 0 }
 0x186   :  { %v1152_v8 = vsel %vm1406_vm3, 0, %v1405_v48  ;;  %v1243_v56 = vsel %vm1241_vm4, %v1242_v28, %v2153_v16  ;;  %v1299_v37 = vsel %vm1298_vm5, %v1297_v10, 0  ;;  %vm1083_vm7 = vcmp.lt.s32.totalorder %v2024_v21, 0 }
 0x187   :  { %v1058_v2 = vand.u32 2147483647, %v1057_v12  ;;  %v1153_v1 = vsub.s32 32, %v1152_v8  ;;  %v1157_v13 = vsub.s32 4294967266, %v1152_v8  ;;  %v1154_v38 = vshll.u32 %v2136_v14, %v1152_v8 }
 0x188   :  { %v1244_v51 = vadd.s32 %v1243_v56, %v1239_v4  ;;  %v1301_v6 = vand.u32 31, %v1299_v37  ;;  %v1067_v14 = vsel %vm2175_vm6, 0, %v1065_v27  ;;  %v1294_v34 = vand.u32 8388607, %v1287_v54 }
 0x189   :  { %v1061_v19 = vmul.f32 %v1060_v22, %v1058_v2  ;;  %v1155_v57 = vshrl.u32 %v1137_v45, %v1153_v1  ;;  %v1158_v50 = vadd.s32 127, %v1157_v13  ;;  %v2192_v46 = vsel %vm1083_vm7, %v1167_v18, %v2126_v59 }
 0x18a   :  { %v1245_v55 = vadd.s32 536870912, %v1244_v51  ;;  %v1302_v39 = vsub.s32 32, %v1301_v6  ;;  %v2194_v47 = vand.u32 3, %v1067_v14  ;;  %vm2200_vm8 = vcmp.le.f32.partialorder %v1081_v17, 0.7853982 }
 0x18b   :  { %v1062_v41 = vxor.u32 2147483648, %v1061_v19  ;;  %v1156_v23 = vor.u32 %v1155_v57, %v1154_v38  ;;  %v1159_v44 = vshll.u32 %v1158_v50, 23  ;;  %v1170_v29 = vsel %vm2200_vm8, 0, %v2192_v46 }
 0x18c   :  { %v2196_v3 = vshrl.u32 %v1245_v55, 30  ;;  %v1295_v33 = vor.u32 8388608, %v1294_v34  ;;  %v1305_v40 = vshrl.u32 %v1702_v9, %v1302_v39  ;;  %v1308_v31 = vshrl.u32 %v1703_v43, %v1302_v39 }
 0x18d   :  { %v1063_v53 = vsel %vm980_vm13, %v1062_v41, %v1061_v19  ;;  %v1160_v58 = vor.u32 4788187, %v1159_v44  ;;  %v1163_v0 = vcvt.s32.f32 %v1156_v23  ;;  %v1311_v42 = vshrl.u32 %v1704_v26, %v1302_v39 }
 0x18e   :  { %v1066_v62 = vsel %vm2175_vm6, %v2022_v61, %v1063_v53  ;;  %v1247_v59 = vshll.u32 %v2196_v3, 30  ;;  %v1314_v17 = vshrl.u32 %v1705_v36, %v1302_v39  ;;  %vm1076_vm9 = vcmp.eq.s32.totalorder %v2194_v47, 2 }
 0x18f   :  { %1657 = vcosq.f32 %v1066_v62  ;;  %v1161_v15 = vand.u32 2147483647, %v1160_v58  ;;  %v2215_v49 = vshrl.u32 %v1299_v37, 5  ;;  %v1304_v16 = vshll.u32 %v1701_v5, %v1301_v6 }
 0x190   :  { %1659 = vsinq.f32 %v1066_v62  ;;  %v2213_v48 = vsub.s32 %v1244_v51, %v1247_v59  ;;  %v1307_v12 = vshll.u32 %v1702_v9, %v1301_v6  ;;  %vm1073_vm10 = vcmp.eq.s32.totalorder %v2194_v47, 0 }
 0x191   :  { %v1164_v30 = vmul.f32 %v1163_v0, %v1161_v15  ;;  %v1310_v35 = vshll.u32 %v1703_v43, %v1301_v6  ;;  %v1313_v27 = vshll.u32 %v1704_v26, %v1301_v6  ;;  %v1317_v45 = vshrl.u32 %v1706_v11, %v1302_v39 }
 0x192   :  { %vm1072_vm11 = vcmp.lt.s32.totalorder %v2194_v47, 2  ;;  %v1240_v10 = vadd.s32 %v2152_v7, %v2159_v24  ;;  %v1250_v2 = vsub.s32 0, %v2213_v48  ;;  %v1306_v22 = vor.u32 %v1305_v40, %v1304_v16 }
 0x193   :  { %v1165_v20 = vxor.u32 2147483648, %v1164_v30  ;;  %v1316_v8 = vshll.u32 %v1705_v36, %v1301_v6  ;;  %vm1070_vm12 = vweird.f32 %v2022_v61  ;;  %v1309_v43 = vor.u32 %v1308_v31, %v1307_v12 }
 0x194   :  { %v1312_v18 = vor.u32 %v1311_v42, %v1310_v35  ;;  %v1315_v26 = vor.u32 %v1314_v17, %v1313_v27  ;;  %v1408_v1 = vmin.u32 %v1250_v2, %v2213_v48  ;;  %v2235_v24 = vshll.u32 %v1295_v33, 8 }
 0x195   :  { %v1166_v9 = vsel %vm1083_vm7, %v1165_v20, %v1164_v30  ;;  %v1318_v7 = vor.u32 %v1317_v45, %v1316_v8  ;;  %v1303_v36 = vshrl.u32 %v1701_v5, %v1302_v39  ;;  %vm1319_vm13 = vcmp.lt.s32.totalorder %v2215_v49, 1 }
 0x196   :  { %v1169_v11 = vsel %vm2200_vm8, %v2024_v21, %v1166_v9  ;;  %vm1320_vm14 = vcmp.lt.s32.totalorder %v2215_v49, 2  ;;  %v1252_v4 = vclz %v1408_v1  ;;  %vm1321_vm15 = vcmp.lt.s32.totalorder %v2215_v49, 3 }
 0x197   :  { %1661 = vcosq.f32 %v1169_v11  ;;  %vm1322_vm0 = vcmp.lt.s32.totalorder %v2215_v49, 4  ;;  %v1327_v38 = vsel %vm1319_vm13, %v1306_v22, %v1309_v43  ;;  %v1331_v5 = vsel %vm1319_vm13, %v1309_v43, %v1312_v18 }
 0x198   :  { %1663 = vsinq.f32 %v1169_v11  ;;  %v1328_v57 = vsel %vm1322_vm0, %v1315_v26, 920167782  ;;  %v1409_v56 = vadd.s32 4294967294, %v1252_v4  ;;  %v1332_v32 = vsel %vm1322_vm0, %v1318_v7, 1326507024 }
 0x199   :  { %v1658_v13 = vpop.eup %1657  ;;  %v1329_v37 = vsel %vm1321_vm15, %v1312_v18, %v1328_v57  ;;  %v1323_v51 = vsel %vm1319_vm13, %v1303_v36, %v1306_v22  ;;  %v1324_v6 = vsel %vm1322_vm0, %v1312_v18, 2102212464  ;;  %v1333_v14 = vsel %vm1321_vm15, %v1315_v26, %v1332_v32 }
 0x19a   :  { %v1660_v28 = vpop.eup %1659  ;;  %v1077_v19 = vxor.u32 2147483648, %v1658_v13  ;;  %vm1410_vm1 = vcmp.lt.s32.totalorder %v1409_v56, 0  ;;  %v1330_v44 = vsel %vm1320_vm14, %v1327_v38, %v1329_v37  ;;  %v1334_v53 = vsel %vm1320_vm14, %v1331_v5, %v1333_v14 }
 0x19b   :  { %v1074_v50 = vxor.u32 2147483648, %v1660_v28  ;;  %v1255_v34 = vsel %vm1410_vm1, 0, %v1409_v56  ;;  %v2263_v39 = vmul.u32.u64.low %v2235_v24, %v1334_v53  ;;  %v2264_v62 = vmul.u32.u64.high %v2235_v24, %v1334_v53, %v2263_v39 }
 0x19c   :  { %v1078_v41 = vsel %vm1076_vm9, %v1077_v19, %v1660_v28  ;;  %v1256_v15 = vsub.s32 32, %v1255_v34  ;;  %v1260_v0 = vsub.s32 4294967266, %v1255_v34  ;;  %v1325_v59 = vsel %vm1321_vm15, %v1309_v43, %v1324_v6 }
 0x19d   :  { %v1075_v23 = vsel %vm1073_vm10, %v1658_v13, %v1074_v50  ;;  %v1174_v47 = vand.u32 3, %v1170_v29  ;;  %v2278_v33 = vmul.u32.u64.low %v2235_v24, %v1330_v44  ;;  %v2279_v40 = vmul.u32.u64.high %v2235_v24, %v1330_v44, %v2278_v33 }
 0x19e   :  { %v1079_v55 = vsel %vm1072_vm11, %v1075_v23, %v1078_v41  ;;  %v1257_v61 = vshll.u32 %v2213_v48, %v1255_v34  ;;  %v1258_v30 = vshrl.u32 %v1240_v10, %v1256_v15  ;;  %v1261_v31 = vadd.s32 127, %v1260_v0 }
 0x19f   :  { %v1080_v58 = vsel %vm1070_vm12, nan, %v1079_v55  ;;  %v1326_v17 = vsel %vm1320_vm14, %v1323_v51, %v1325_v59  ;;  %vm1344_vm2 = vc.u32 %v2264_v62, %v2278_v33  ;;  %vm1179_vm3 = vcmp.eq.s32.totalorder %v1174_v47, 2 }
 0x1a0   :  { %1390 = vst [vmem:[%s2314_s3] sm:$0xff] %v1080_v58  ;;  %v1259_v20 = vor.u32 %v1258_v30, %v1257_v61  ;;  %v1262_v35 = vshll.u32 %v1261_v31, 23  ;;  %v1345_v60 = vadd.s32 1, %v2279_v40  ;;  %vm1176_vm4 = vcmp.eq.s32.totalorder %v1174_v47, 0 }
 0x1a1   :  { %v1662_v42 = vpop.eup %1661  ;;  %v1342_v48 = vmul.u32 %v2235_v24, %v1326_v17  ;;  %vm1173_vm5 = vweird.f32 %v2024_v21  ;;  %vm1175_vm6 = vcmp.lt.s32.totalorder %v1174_v47, 2  ;;  %vm1186_vm7 = vcmp.lt.s32.totalorder %v2034_v52, 0 }
 0x1a2   :  { %v1664_v16 = vpop.eup %1663  ;;  %v1180_v12 = vxor.u32 2147483648, %v1662_v42  ;;  %v1263_v27 = vor.u32 4788187, %v1262_v35  ;;  %v1346_v45 = vsel %vm1344_vm2, %v1345_v60, %v2279_v40  ;;  %v1266_v22 = vcvt.s32.f32 %v1259_v20 }
 0x1a3   :  { %v1177_v46 = vxor.u32 2147483648, %v1664_v16  ;;  %v1347_v8 = vadd.s32 %v1346_v45, %v1342_v48  ;;  %v1270_v21 = vsub.s32 4, %v2196_v3  ;;  %vm1185_vm8 = vcmp.le.f32.partialorder %v1184_v63, 0.7853982 }
 0x1a4   :  { %v1181_v29 = vsel %vm1179_vm3, %v1180_v12, %v1664_v16  ;;  %v1264_v2 = vand.u32 2147483647, %v1263_v27  ;;  %v1343_v41 = vadd.s32 %v2278_v33, %v2264_v62  ;;  %vm1276_vm13 = vweird.f32 %v2034_v52 }
 0x1a5   :  { %v1178_v49 = vsel %vm1176_vm4, %v1662_v42, %v1177_v46  ;;  %v1348_v18 = vadd.s32 536870912, %v1347_v8  ;;  %v1271_v13 = vsel %vm1186_vm7, %v1270_v21, %v2196_v3  ;;  %vm1289_vm14 = vcmp.lt.s32.totalorder %v2036_v25, 0 }
 0x1a6   :  { %v1182_v10 = vsel %vm1175_vm6, %v1178_v49, %v1181_v29  ;;  %v1267_v43 = vmul.f32 %v1266_v22, %v1264_v2  ;;  %v1273_v28 = vsel %vm1185_vm8, 0, %v1271_v13  ;;  %vm1288_vm15 = vcmp.le.f32.partialorder %v1287_v54, 0.7853982 }
 0x1a7   :  { %v1183_v9 = vsel %vm1173_vm5, nan, %v1182_v10  ;;  %v1349_v11 = vshrl.u32 %v1348_v18, 30  ;;  %v1277_v57 = vand.u32 3, %v1273_v28  ;;  %vm1379_vm3 = vweird.f32 %v2036_v25 }
 0x1a8   :  { %1391 = vst [vmem:[%s2314_s3 + $0x8] sm:$0xff] %v1183_v9  ;;  %v1268_v26 = vxor.u32 2147483648, %v1267_v43 }
 0x1a9   :  { %v1350_v7 = vshll.u32 %v1349_v11, 30  ;;  %vm1282_vm10 = vcmp.eq.s32.totalorder %v1277_v57, 2  ;;  %vm1278_vm11 = vcmp.lt.s32.totalorder %v1277_v57, 2  ;;  %vm1279_vm12 = vcmp.eq.s32.totalorder %v1277_v57, 0 }
 0x1aa   :  { %v1269_v1 = vsel %vm1186_vm7, %v1268_v26, %v1267_v43 }
 0x1ab   :  { %v1272_v24 = vsel %vm1185_vm8, %v2034_v52, %v1269_v1  ;;  %v1351_v36 = vsub.s32 %v1347_v8, %v1350_v7  ;;  %v1373_v52 = vsub.s32 4, %v1349_v11 }
 0x1ac   :  { %1665 = vcosq.f32 %v1272_v24 }
 0x1ad   :  { %1667 = vsinq.f32 %v1272_v24  ;;  %v1353_v4 = vsub.s32 0, %v1351_v36  ;;  %v1374_v61 = vsel %vm1289_vm14, %v1373_v52, %v1349_v11 }
 0x1ae   :  { %v1376_v30 = vsel %vm1288_vm15, 0, %v1374_v61 }
 0x1af   :  { %v1412_v19 = vmin.u32 %v1353_v4, %v1351_v36  ;;  %v1380_v31 = vand.u32 3, %v1376_v30 }
 0x1b1   :  { %v1355_v38 = vclz %v1412_v19  ;;  %vm1385_vm0 = vcmp.eq.s32.totalorder %v1380_v31, 2  ;;  %vm1382_vm1 = vcmp.eq.s32.totalorder %v1380_v31, 0  ;;  %vm1381_vm2 = vcmp.lt.s32.totalorder %v1380_v31, 2 }
 0x1b3   :  { %v1413_v5 = vadd.s32 4294967294, %v1355_v38 }
 0x1b5   :  { %vm1414_vm9 = vcmp.lt.s32.totalorder %v1413_v5, 0 }
 0x1b6   :  { %v1666_v50 = vpop.eup %1665  ;;  %v1358_v37 = vsel %vm1414_vm9, 0, %v1413_v5 }
 0x1b7   :  { %v1668_v56 = vpop.eup %1667  ;;  %v1283_v63 = vxor.u32 2147483648, %v1666_v50  ;;  %v1359_v51 = vsub.s32 32, %v1358_v37  ;;  %v1363_v6 = vsub.s32 4294967266, %v1358_v37  ;;  %v1360_v23 = vshll.u32 %v1351_v36, %v1358_v37 }
 0x1b8   :  { %v1280_v32 = vxor.u32 2147483648, %v1668_v56 }
 0x1b9   :  { %v1284_v3 = vsel %vm1282_vm10, %v1283_v63, %v1668_v56  ;;  %v1361_v44 = vshrl.u32 %v1343_v41, %v1359_v51  ;;  %v1364_v53 = vadd.s32 127, %v1363_v6 }
 0x1ba   :  { %v1281_v14 = vsel %vm1279_vm12, %v1666_v50, %v1280_v32 }
 0x1bb   :  { %v1285_v55 = vsel %vm1278_vm11, %v1281_v14, %v1284_v3  ;;  %v1362_v39 = vor.u32 %v1361_v44, %v1360_v23  ;;  %v1365_v58 = vshll.u32 %v1364_v53, 23 }
 0x1bc   :  { %v1286_v34 = vsel %vm1276_vm13, nan, %v1285_v55 }
 0x1bd   :  { %1392 = vst [vmem:[%s2314_s3 + $0x10] sm:$0xff] %v1286_v34  ;;  %v1366_v62 = vor.u32 4788187, %v1365_v58  ;;  %v1369_v0 = vcvt.s32.f32 %v1362_v39 }
 0x1bf   :  { %v1367_v15 = vand.u32 2147483647, %v1366_v62 }
 0x1c1   :  { %v1370_v59 = vmul.f32 %v1369_v0, %v1367_v15 }
 0x1c3   :  { %v1371_v47 = vxor.u32 2147483648, %v1370_v59 }
 0x1c5   :  { %v1372_v33 = vsel %vm1289_vm14, %v1371_v47, %v1370_v59 }
 0x1c6   :  { %v1375_v40 = vsel %vm1288_vm15, %v2036_v25, %v1372_v33 }
 0x1c7   :  { %1669 = vcosq.f32 %v1375_v40 }
 0x1c8   :  { %1671 = vsinq.f32 %v1375_v40 }
 0x1d1   :  { %v1670_v42 = vpop.eup %1669 }
 0x1d2   :  { %v1672_v17 = vpop.eup %1671  ;;  %v1386_v16 = vxor.u32 2147483648, %v1670_v42 }
 0x1d3   :  { %v1383_v12 = vxor.u32 2147483648, %v1672_v17 }
 0x1d4   :  { %v1387_v20 = vsel %vm1385_vm0, %v1386_v16, %v1672_v17 }
 0x1d5   :  { %v1384_v35 = vsel %vm1382_vm1, %v1670_v42, %v1383_v12 }
 0x1d6   :  { %v1388_v54 = vsel %vm1381_vm2, %v1384_v35, %v1387_v20 }
 0x1d7   :  { %v1389_v46 = vsel %vm1379_vm3, nan, %v1388_v54 }
 0x1d8   :  { %1393 = vst [vmem:[%s2314_s3 + $0x18] sm:$0xff] %v1389_v46 }
 0x1d9   :  { %1398 = vsyncpa [#allocation3], 1 }

</bundles_post_ra>
